<compile_context>
chip_gen: v6e
topology: v6e:2x2x1
jax: 0.10.0
libtpu: 0.0.40
codegen_flags: <defaults>
</compile_context>

<pallas_src>
import functools

import numpy as np
import jax
import jax.numpy as jnp
from jax import lax
from jax.experimental import pallas as pl
from jax.experimental.pallas import tpu as pltpu

_DEFAULT_ROW_BLOCK = 1024  # 8192 cameras / grid step; 512 KiB output block.


def _intrin_packed_kernel(order, H, W, fx_ref, out_ref):
    """fx_ref: (rb, 8) f32 — 8 cameras per row.
    out_ref: (rb, 128) f32 — 8 row-major 4x4 matrices packed per 128-lane row."""
    f = fx_ref[...]                                   # (rb, 8)
    if order == 2:
        focal = f * f * jnp.float32(W)                # fx^2 * W
    else:
        focal = f * jnp.float32(W)                    # fx * W

    cols = lax.broadcasted_iota(jnp.int32, (1, 128), 1)
    lane = cols & 15                                  # element index within 4x4
    group = cols >> 4                                 # which of the 8 matrices

    # Constant part of K (principal point + homogeneous rows).
    base = jnp.where(
        lane == 2, jnp.float32(W / 2.0),
        jnp.where(
            lane == 6, jnp.float32(H / 2.0),
            jnp.where((lane == 10) | (lane == 15), jnp.float32(1.0),
                      jnp.float32(0.0))))
    diag = (lane == 0) | (lane == 5)                  # focal slots (0,0), (1,1)

    rb = out_ref.shape[0]
    out = jnp.broadcast_to(base, (rb, 128))
    # Expand focal (rb, 8) -> (rb, 128): camera j fills lanes 16j..16j+15.
    # Unrolled at trace time; each step is a static lane slice + broadcast + select.
    for j in range(8):
        out = jnp.where(diag & (group == j), focal[:, j:j + 1], out)
    out_ref[...] = out


def learn_intrin_forward_batched(fx_vec, H, W, order=2,
                                 row_block=_DEFAULT_ROW_BLOCK):
    """N cameras in one dispatch: fx_vec (N,) -> (N, 4, 4) float32."""
    assert order in (1, 2), "Focal init order need to be 1 or 2."
    fx_vec = jnp.asarray(fx_vec, jnp.float32).reshape(-1)
    N = int(fx_vec.shape[0])
    if N == 0:
        return jnp.zeros((0, 4, 4), jnp.float32)

    R = -(-N // 8)                                    # rows of 8 packed matrices
    kernel = functools.partial(_intrin_packed_kernel, order, H, W)

    if R <= row_block:
        # Whole problem in one grid-less step; no compiler params needed.
        padded_N = R * 8
        fx2d = jnp.pad(fx_vec, (0, padded_N - N)).reshape(R, 8)
        flat = pl.pallas_call(
            kernel,
            out_shape=jax.ShapeDtypeStruct((R, 128), jnp.float32),
            in_specs=[pl.BlockSpec((R, 8), lambda: (0, 0))],
            out_specs=pl.BlockSpec((R, 128), lambda: (0, 0)),
        )(fx2d)
    else:
        # Huge N: grid over row blocks; 'parallel' lets megacore split cameras
        # and BlockSpec double-buffering pipelines compute with writeback.
        assert row_block % 8 == 0, "row_block must be a multiple of 8."
        grid_rows = -(-R // row_block)
        R = grid_rows * row_block
        padded_N = R * 8
        fx2d = jnp.pad(fx_vec, (0, padded_N - N)).reshape(R, 8)
        flat = pl.pallas_call(
            kernel,
            out_shape=jax.ShapeDtypeStruct((R, 128), jnp.float32),
            grid=(grid_rows,),
            in_specs=[pl.BlockSpec((row_block, 8), lambda i: (i, 0))],
            out_specs=pl.BlockSpec((row_block, 128), lambda i: (i, 0)),
            compiler_params=pltpu.CompilerParams(
                dimension_semantics=("parallel",)),
        )(fx2d)

    # Free row-major reshape: (R, 128) -> (padded_N, 16) -> (padded_N, 4, 4).
    return flat.reshape(padded_N, 4, 4)[:N]


def learn_intrin_forward(fx, H, W, order=2):
    """Pallas equivalent of LearnIntrin.forward(): returns (4, 4) float32.

    Routes through the batched kernel with N=1 (single shared code path)."""
    fx1 = jnp.reshape(jnp.asarray(fx, jnp.float32), (1,))
    return learn_intrin_forward_batched(fx1, H, W, order=order)[0]


if __name__ == "__main__":
    H, W = 16, 16
    order = 2

    # Deterministic init mirroring __init__ with init_focal given:
    # fx = sqrt(init_focal / W) for order==2.
    key = jax.random.PRNGKey(0)
    init_focal = jax.random.uniform(key, (), jnp.float32, minval=10.0, maxval=30.0)
    fx = jnp.sqrt(init_focal / float(W))

    def reference(fx_scalar, order_):
        f = float(fx_scalar)                          # mirrors self.fx.item()
        focal = (f ** 2 if order_ == 2 else f) * W
        k = np.array([[focal, 0.0, W / 2, 0.0],
                      [0.0, focal, H / 2, 0.0],
                      [0.0, 0.0, 1.0, 0.0],
                      [0.0, 0.0, 0.0, 1.0]], dtype=np.float32)
        return jnp.asarray(k)

    # Single-camera path (N=1 through the batched kernel).
    out = jax.block_until_ready(learn_intrin_forward(fx, H, W, order=order))
    assert out.shape == (4, 4) and out.dtype == jnp.float32
    assert jnp.allclose(out, reference(fx, order), atol=1e-5, rtol=1e-5)

    # order == 1 path and default __init__ path (init_focal=None -> fx = 1.0).
    out_o1 = jax.block_until_ready(learn_intrin_forward(fx, H, W, order=1))
    assert jnp.allclose(out_o1, reference(fx, 1), atol=1e-5, rtol=1e-5)
    out_def = jax.block_until_ready(
        learn_intrin_forward(jnp.float32(1.0), H, W, order=order))
    assert jnp.allclose(out_def, reference(1.0, order), atol=1e-5, rtol=1e-5)

    # Batched path, N not a multiple of 8 (exercises padding), single-step block.
    fx_small = jax.random.uniform(jax.random.PRNGKey(1), (5,), jnp.float32,
                                  minval=0.5, maxval=2.0)
    batched = jax.block_until_ready(
        learn_intrin_forward_batched(fx_small, H, W, order=order))
    assert batched.shape == (5, 4, 4) and batched.dtype == jnp.float32
    for i in range(5):
        assert jnp.allclose(batched[i], reference(fx_small[i], order),
                            atol=1e-5, rtol=1e-5)

    # Gridded path (small row_block to exercise the multi-block 'parallel' branch).
    fx_big = jax.random.uniform(jax.random.PRNGKey(2), (72,), jnp.float32,
                                minval=0.5, maxval=2.0)
    grid_out = jax.block_until_ready(
        learn_intrin_forward_batched(fx_big, H, W, order=order, row_block=8))
    assert grid_out.shape == (72, 4, 4) and grid_out.dtype == jnp.float32
    for i in (0, 7, 8, 35, 63, 64, 71):
        assert jnp.allclose(grid_out[i], reference(fx_big[i], order),
                            atol=1e-5, rtol=1e-5)

    print("KERNEL_OK")
</pallas_src>

<mosaic_0001>
module attributes {stable_mosaic.version = 11 : i64} {
  func.func @_intrin_packed_kernel(%arg0: memref<1x8xf32, #tpu.memory_space<vmem>>, %arg1: memref<1x128xf32, #tpu.memory_space<vmem>>) attributes {dimension_semantics = [], scalar_prefetch = 0 : i64, scratch_operands = 0 : i64, tpu.core_type = #tpu.core_type<tc>} {
    %c0 = arith.constant 0 : index
    %c0_0 = arith.constant 0 : index
    %0 = vector.load %arg0[%c0, %c0_0] : memref<1x8xf32, #tpu.memory_space<vmem>>, vector<1x8xf32>
    %1 = arith.mulf %0, %0 : vector<1x8xf32>
    %cst = arith.constant 1.600000e+01 : f32
    %2 = vector.broadcast %cst : f32 to vector<1x8xf32>
    %3 = arith.mulf %1, %2 : vector<1x8xf32>
    %4 = tpu.iota {dimensions = array<i32: 1>} : vector<1x128xi32>
    %c15_i32 = arith.constant 15 : i32
    %5 = vector.broadcast %c15_i32 : i32 to vector<1x128xi32>
    %6 = arith.andi %4, %5 : vector<1x128xi32>
    %c4_i32 = arith.constant 4 : i32
    %7 = vector.broadcast %c4_i32 : i32 to vector<1x128xi32>
    %8 = arith.shrsi %4, %7 : vector<1x128xi32>
    %c2_i32 = arith.constant 2 : i32
    %9 = vector.broadcast %c2_i32 : i32 to vector<1x128xi32>
    %10 = arith.cmpi eq, %6, %9 : vector<1x128xi32>
    %c6_i32 = arith.constant 6 : i32
    %11 = vector.broadcast %c6_i32 : i32 to vector<1x128xi32>
    %12 = arith.cmpi eq, %6, %11 : vector<1x128xi32>
    %c10_i32 = arith.constant 10 : i32
    %13 = vector.broadcast %c10_i32 : i32 to vector<1x128xi32>
    %14 = arith.cmpi eq, %6, %13 : vector<1x128xi32>
    %c15_i32_1 = arith.constant 15 : i32
    %15 = vector.broadcast %c15_i32_1 : i32 to vector<1x128xi32>
    %16 = arith.cmpi eq, %6, %15 : vector<1x128xi32>
    %17 = arith.ori %14, %16 : vector<1x128xi1>
    %cst_2 = arith.constant 1.000000e+00 : f32
    %cst_3 = arith.constant 0.000000e+00 : f32
    %18 = vector.broadcast %cst_2 : f32 to vector<1x128xf32>
    %19 = vector.broadcast %cst_3 : f32 to vector<1x128xf32>
    %20 = arith.select %17, %18, %19 : vector<1x128xi1>, vector<1x128xf32>
    %cst_4 = arith.constant 8.000000e+00 : f32
    %21 = vector.broadcast %cst_4 : f32 to vector<1x128xf32>
    %22 = arith.select %12, %21, %20 : vector<1x128xi1>, vector<1x128xf32>
    %cst_5 = arith.constant 8.000000e+00 : f32
    %23 = vector.broadcast %cst_5 : f32 to vector<1x128xf32>
    %24 = arith.select %10, %23, %22 : vector<1x128xi1>, vector<1x128xf32>
    %c0_i32 = arith.constant 0 : i32
    %25 = vector.broadcast %c0_i32 : i32 to vector<1x128xi32>
    %26 = arith.cmpi eq, %6, %25 : vector<1x128xi32>
    %c5_i32 = arith.constant 5 : i32
    %27 = vector.broadcast %c5_i32 : i32 to vector<1x128xi32>
    %28 = arith.cmpi eq, %6, %27 : vector<1x128xi32>
    %29 = arith.ori %26, %28 : vector<1x128xi1>
    %c0_i32_6 = arith.constant 0 : i32
    %30 = vector.broadcast %c0_i32_6 : i32 to vector<1x128xi32>
    %31 = arith.cmpi eq, %8, %30 : vector<1x128xi32>
    %32 = arith.andi %29, %31 : vector<1x128xi1>
    %33 = vector.extract_strided_slice %3 {offsets = [0, 0], sizes = [1, 1], strides = [1, 1]} : vector<1x8xf32> to vector<1x1xf32>
    %34 = vector.shape_cast %33 : vector<1x1xf32> to vector<1x1xf32>
    %35 = vector.broadcast %34 : vector<1x1xf32> to vector<1x128xf32>
    %36 = arith.select %32, %35, %24 : vector<1x128xi1>, vector<1x128xf32>
    %c1_i32 = arith.constant 1 : i32
    %37 = vector.broadcast %c1_i32 : i32 to vector<1x128xi32>
    %38 = arith.cmpi eq, %8, %37 : vector<1x128xi32>
    %39 = arith.andi %29, %38 : vector<1x128xi1>
    %40 = vector.extract_strided_slice %3 {offsets = [0, 1], sizes = [1, 1], strides = [1, 1]} : vector<1x8xf32> to vector<1x1xf32>
    %41 = vector.shape_cast %40 : vector<1x1xf32> to vector<1x1xf32>
    %42 = vector.broadcast %41 : vector<1x1xf32> to vector<1x128xf32>
    %43 = arith.select %39, %42, %36 : vector<1x128xi1>, vector<1x128xf32>
    %c2_i32_7 = arith.constant 2 : i32
    %44 = vector.broadcast %c2_i32_7 : i32 to vector<1x128xi32>
    %45 = arith.cmpi eq, %8, %44 : vector<1x128xi32>
    %46 = arith.andi %29, %45 : vector<1x128xi1>
    %47 = vector.extract_strided_slice %3 {offsets = [0, 2], sizes = [1, 1], strides = [1, 1]} : vector<1x8xf32> to vector<1x1xf32>
    %48 = vector.shape_cast %47 : vector<1x1xf32> to vector<1x1xf32>
    %49 = vector.broadcast %48 : vector<1x1xf32> to vector<1x128xf32>
    %50 = arith.select %46, %49, %43 : vector<1x128xi1>, vector<1x128xf32>
    %c3_i32 = arith.constant 3 : i32
    %51 = vector.broadcast %c3_i32 : i32 to vector<1x128xi32>
    %52 = arith.cmpi eq, %8, %51 : vector<1x128xi32>
    %53 = arith.andi %29, %52 : vector<1x128xi1>
    %54 = vector.extract_strided_slice %3 {offsets = [0, 3], sizes = [1, 1], strides = [1, 1]} : vector<1x8xf32> to vector<1x1xf32>
    %55 = vector.shape_cast %54 : vector<1x1xf32> to vector<1x1xf32>
    %56 = vector.broadcast %55 : vector<1x1xf32> to vector<1x128xf32>
    %57 = arith.select %53, %56, %50 : vector<1x128xi1>, vector<1x128xf32>
    %c4_i32_8 = arith.constant 4 : i32
    %58 = vector.broadcast %c4_i32_8 : i32 to vector<1x128xi32>
    %59 = arith.cmpi eq, %8, %58 : vector<1x128xi32>
    %60 = arith.andi %29, %59 : vector<1x128xi1>
    %61 = vector.extract_strided_slice %3 {offsets = [0, 4], sizes = [1, 1], strides = [1, 1]} : vector<1x8xf32> to vector<1x1xf32>
    %62 = vector.shape_cast %61 : vector<1x1xf32> to vector<1x1xf32>
    %63 = vector.broadcast %62 : vector<1x1xf32> to vector<1x128xf32>
    %64 = arith.select %60, %63, %57 : vector<1x128xi1>, vector<1x128xf32>
    %c5_i32_9 = arith.constant 5 : i32
    %65 = vector.broadcast %c5_i32_9 : i32 to vector<1x128xi32>
    %66 = arith.cmpi eq, %8, %65 : vector<1x128xi32>
    %67 = arith.andi %29, %66 : vector<1x128xi1>
    %68 = vector.extract_strided_slice %3 {offsets = [0, 5], sizes = [1, 1], strides = [1, 1]} : vector<1x8xf32> to vector<1x1xf32>
    %69 = vector.shape_cast %68 : vector<1x1xf32> to vector<1x1xf32>
    %70 = vector.broadcast %69 : vector<1x1xf32> to vector<1x128xf32>
    %71 = arith.select %67, %70, %64 : vector<1x128xi1>, vector<1x128xf32>
    %c6_i32_10 = arith.constant 6 : i32
    %72 = vector.broadcast %c6_i32_10 : i32 to vector<1x128xi32>
    %73 = arith.cmpi eq, %8, %72 : vector<1x128xi32>
    %74 = arith.andi %29, %73 : vector<1x128xi1>
    %75 = vector.extract_strided_slice %3 {offsets = [0, 6], sizes = [1, 1], strides = [1, 1]} : vector<1x8xf32> to vector<1x1xf32>
    %76 = vector.shape_cast %75 : vector<1x1xf32> to vector<1x1xf32>
    %77 = vector.broadcast %76 : vector<1x1xf32> to vector<1x128xf32>
    %78 = arith.select %74, %77, %71 : vector<1x128xi1>, vector<1x128xf32>
    %c7_i32 = arith.constant 7 : i32
    %79 = vector.broadcast %c7_i32 : i32 to vector<1x128xi32>
    %80 = arith.cmpi eq, %8, %79 : vector<1x128xi32>
    %81 = arith.andi %29, %80 : vector<1x128xi1>
    %82 = vector.extract_strided_slice %3 {offsets = [0, 7], sizes = [1, 1], strides = [1, 1]} : vector<1x8xf32> to vector<1x1xf32>
    %83 = vector.shape_cast %82 : vector<1x1xf32> to vector<1x1xf32>
    %84 = vector.broadcast %83 : vector<1x1xf32> to vector<1x128xf32>
    %85 = arith.select %81, %84, %78 : vector<1x128xi1>, vector<1x128xf32>
    %c0_11 = arith.constant 0 : index
    %c0_12 = arith.constant 0 : index
    %86 = vector.load %arg1[%c0_11, %c0_12] : memref<1x128xf32, #tpu.memory_space<vmem>>, vector<1x128xf32>
    tpu.vector_store %arg1[%c0_11, %c0_12], %85 {strides = array<i32>} : memref<1x128xf32, #tpu.memory_space<vmem>>, vector<1x128xf32>,
    return
  }
}

</mosaic_0001>

<bundles_post_ra>
// kernel: tpu_custom_call.1
= control target key start
LH: loop header
LB: loop body
LE: loop exit
PB: predicated region body
PF: predicated region fallthrough
CT: control target
= control target key end

     0   :  { %6 = vsyncpa [#allocation3], 0  ;;  %s255_s0 = inlined_call_operand.hbm [shape: f32[1,8], index: 0, kind: input, shape index: {}]   ;;  %s256_s1 = inlined_call_operand.hbm [shape: f32[1,128], index: 1, kind: output, shape index: {}]  }
   0x1   :  { %7 = vsyncpa [#allocation4], 0  ;;  %s208_s6 = smov [#allocation2]  }
   0x2   :  { %s14_s7 = sshll.u32 %s208_s6, 4  ;;  %s15_s7 = int_to_ptr.vmem [resolvable:$true] %s14_s7 }
   0x3   :  { %s172_s8 = scalar_lea.vmem %s15_s7, 16  ;;  %s176_s9 = scalar_lea.vmem %s15_s7, 32 }
   0x4   :  { %p173_p0 = scmp.ne.s32.totalorder %s15_s7, %s172_s8  ;;  %p177_p1 = scmp.lt.s32.totalorder %s15_s7, %s15_s7 }
   0x5   :  { %p178_p2 = scmp.lt.s32.totalorder %s176_s9, %s172_s8 }
   0x7   :  { %p179_p3 = por %p178_p2, %p177_p1 }
   0x9   :  { %p180_p4 = pnand %p179_p3, %p173_p0 }
   0xb   :  { %183 = shalt.err (!%p180_p4)
}
   0xc   :  { %17 = dma.hbm_to_vmem [thread:$0]  %s255_s0, 16, %s15_s7, [#allocation3]  }
   0xd   :  { %204 = dma.done.wait [#allocation3], 16  }
   0xe   :  { %205 = vsyncadd [#allocation3], 4294967280  ;;  %v209_v0 = vmov 2   ;;  %v210_v1 = vmov 0   ;;  %v21_v2 = vld [vmem:[#allocation2] sm:$0x1]  ;;  %v24_v11 = vlaneseq }
   0xf   :  { %157 = vset.pattern.permute.xlu1 %v209_v0  ;;  %155 = vset.pattern.permute.xlu0 %v210_v1  ;;  %v22_v3 = vmul.f32 %v21_v2, %v21_v2  ;;  %v211_v5 = vmov 3   ;;  %v212_v6 = vmov 1   ;;  %v213_v7 = vmov 4   ;;  %s218_s0 = smov [#allocation5]  }
  0x10   :  { %v214_v8 = vmov 5   ;;  %v215_v9 = vmov 6   ;;  %v216_v10 = vmov 7   ;;  %v25_v12 = vand.u32 127, %v24_v11  ;;  %s135_s12 = sshll.u32 %s218_s0, 4  ;;  %s136_s12 = int_to_ptr.vmem [resolvable:$true] %s135_s12 }
  0x11   :  { %v23_v4 = vmul.f32 16.0, %v22_v3  ;;  %v47_v14 = vshrl.u32 %v24_v11, 7  ;;  %v217_v16 = vmov 0.0   ;;  %s184_s13 = scalar_lea.vmem %s136_s12, 16  ;;  %s188_s14 = scalar_lea.vmem %s136_s12, 32 }
  0x12   :  { %v26_v13 = vand.u32 15, %v25_v12  ;;  %v27_v15 = vshra.s32 %v25_v12, 4  ;;  %p185_p5 = scmp.ne.s32.totalorder %s136_s12, %s184_s13  ;;  %p189_p6 = scmp.lt.s32.totalorder %s136_s12, %s136_s12 }
  0x13   :  { %65 = vperm.xlu1 %157, %v23_v4   ;;  %43 = vperm.xlu0 %155, %v23_v4   ;;  %v48_v20 = vsub.s32 0, %v47_v14  ;;  %p190_p7 = scmp.lt.s32.totalorder %s188_s14, %s184_s13 }
  0x14   :  { %vm30_vm0 = vcmp.eq.s32.totalorder %v26_v13, 10  ;;  %vm31_vm1 = vcmp.eq.s32.totalorder %v26_v13, 15  ;;  %vm29_vm3 = vcmp.eq.s32.totalorder %v26_v13, 6  ;;  %vm36_vm4 = vcmp.eq.s32.totalorder %v26_v13, 0 }
  0x15   :  { %vm32_vm2 = vmor %vm30_vm0, %vm31_vm1  ;;  %vm37_vm5 = vcmp.eq.s32.totalorder %v26_v13, 5  ;;  %vm28_vm6 = vcmp.eq.s32.totalorder %v26_v13, 2  ;;  %vm39_vm8 = vcmp.eq.s32.totalorder %v27_v15, 0  ;;  %vm51_vm10 = vcmp.eq.s32.totalorder %v27_v15, 1  ;;  %p191_p8 = por %p190_p7, %p189_p6 }
  0x16   :  { %v33_v17 = vsel %vm32_vm2, 1.0, %v217_v16  ;;  %vm232_vm7 = vmor %vm36_vm4, %vm37_vm5  ;;  %vm62_vm12 = vcmp.eq.s32.totalorder %v27_v15, 2  ;;  %vm73_vm14 = vcmp.eq.s32.totalorder %v27_v15, 3  ;;  %vm84_vm15 = vcmp.eq.s32.totalorder %v27_v15, 4 }
  0x17   :  { %158 = vset.pattern.permute.xlu1 %v211_v5  ;;  %156 = vset.pattern.permute.xlu0 %v212_v6  ;;  %v34_v21 = vsel %vm29_vm3, 8.0, %v33_v17  ;;  %vm40_vm9 = vmand %vm232_vm7, %vm39_vm8  ;;  %vm95_vm2 = vcmp.eq.s32.totalorder %v27_v15, 5  ;;  %vm106_vm3 = vcmp.eq.s32.totalorder %v27_v15, 6  ;;  %vm117_vm4 = vcmp.eq.s32.totalorder %v27_v15, 7  ;;  %p192_p9 = pnand %p191_p8, %p185_p5 }
  0x18   :  { %76 = vperm.xlu1 %158, %v23_v4   ;;  %54 = vperm.xlu0 %156, %v23_v4   ;;  %v35_v24 = vsel %vm28_vm6, 8.0, %v34_v21  ;;  %vm52_vm11 = vmand %vm232_vm7, %vm51_vm10 }
  0x19   :  { %vm63_vm13 = vmand %vm232_vm7, %vm62_vm12 }
  0x1a   :  { %vm74_vm0 = vmand %vm232_vm7, %vm73_vm14 }
  0x1b   :  { %vm85_vm1 = vmand %vm232_vm7, %vm84_vm15 }
  0x1c   :  { %159 = vset.pattern.permute.xlu1 %v213_v7  ;;  %160 = vset.pattern.permute.xlu0 %v214_v8  ;;  %vm96_vm5 = vmand %vm232_vm7, %vm95_vm2 }
  0x1d   :  { %87 = vperm.xlu1 %159, %v23_v4   ;;  %98 = vperm.xlu0 %160, %v23_v4   ;;  %vm107_vm6 = vmand %vm232_vm7, %vm106_vm3 }
  0x1e   :  { %vm118_vm8 = vmand %vm232_vm7, %vm117_vm4 }
  0x21   :  { %161 = vset.pattern.permute.xlu1 %v215_v9  ;;  %163 = vset.pattern.permute.xlu0 %v216_v10 }
  0x22   :  { %109 = vperm.xlu1 %161, %v23_v4  }
  0x26   :  { %162 = vset.pattern.permute.xlu1 %v216_v10 }
  0x27   :  { %120 = vperm.xlu1 %162, %v23_v4  }
  0x8e   :  { %v66_v18 = vpop.permute.xlu1 %65  ;;  %v44_v19 = vpop.permute.xlu0 %43 }
  0x8f   :  { %v49_v23 = vrot.slane %v44_v19, %v48_v20  ;;  %v71_v31 = vrot.slane %v66_v18, %v48_v20 }
  0x91   :  { %v50_v28 = vsel %vm40_vm9, %v49_v23, %v35_v24 }
  0x93   :  { %v77_v25 = vpop.permute.xlu1 %76  ;;  %v55_v26 = vpop.permute.xlu0 %54 }
  0x94   :  { %v60_v27 = vrot.slane %v55_v26, %v48_v20  ;;  %v82_v35 = vrot.slane %v77_v25, %v48_v20 }
  0x96   :  { %v61_v30 = vsel %vm52_vm11, %v60_v27, %v50_v28 }
  0x97   :  { %v72_v32 = vsel %vm63_vm13, %v71_v31, %v61_v30 }
  0x98   :  { %v88_v29 = vpop.permute.xlu1 %87  ;;  %v99_v34 = vpop.permute.xlu0 %98  ;;  %v83_v37 = vsel %vm74_vm0, %v82_v35, %v72_v32 }
  0x99   :  { %v93_v33 = vrot.slane %v88_v29, %v48_v20  ;;  %v104_v38 = vrot.slane %v99_v34, %v48_v20 }
  0x9b   :  { %v94_v39 = vsel %vm85_vm1, %v93_v33, %v83_v37 }
  0x9c   :  { %v105_v42 = vsel %vm96_vm5, %v104_v38, %v94_v39 }
  0x9d   :  { %v110_v36 = vpop.permute.xlu1 %109 }
  0x9e   :  { %v115_v40 = vrot.slane %v110_v36, %v48_v20 }
  0xa0   :  { %v116_v44 = vsel %vm107_vm6, %v115_v40, %v105_v42 }
  0xa2   :  { %v121_v41 = vpop.permute.xlu1 %120 }
  0xa3   :  { %v126_v43 = vrot.slane %v121_v41, %v48_v20 }
  0xa5   :  { %v127_v45 = vsel %vm118_vm8, %v126_v43, %v116_v44 }
  0xa6   :  { %128 = vst [vmem:[#allocation5] sm:$0x1] %v127_v45 }
  0xa7   :  { %195 = shalt.err (!%p192_p9)
}
  0xa8   :  { %138 = dma.vmem_to_hbm [thread:$0]  %s136_s12, 16, %s256_s1, [#allocation4]  }
  0xa9   :  { %206 = dma.done.wait [#allocation4], 16  }
  0xaa   :  { %207 = vsyncadd [#allocation4], 4294967280 }
  0xab   :  { %142 = vsyncpa [#allocation3], 1 }
  0xac   :  { %143 = vsyncpa [#allocation4], 1 }

</bundles_post_ra>
